<compile_context>
chip_gen: v7x
topology: tpu7x:2x2x1
jax: 0.10.0
libtpu: 0.0.40
codegen_flags: <defaults>
</compile_context>

<pallas_src>
import functools

import jax
import jax.numpy as jnp
from jax import lax
from jax.experimental import pallas as pl
from jax.experimental.pallas import tpu as pltpu


def _contrastive_loss_kernel(im_ref, s_ref, dcol_ref, drow_ref, out_ref,
                             row_max_ref, col_max_ref, *,
                             margin, max_violation, tm, tn, num_i, num_j):
    i = pl.program_id(0)
    j = pl.program_id(1)

    # MXU: scores[a, b] = <im_i[a, :], s_j[b, :]>.  Contract on the last dim of
    # both operands (avoids materializing s.T); accumulate in f32.  Inputs are
    # fed at their native dtype (bf16 inputs stay bf16 into the MXU).
    scores = lax.dot_general(
        im_ref[...], s_ref[...],
        dimension_numbers=(((1,), (1,)), ((), ())),
        preferred_element_type=jnp.float32)                      # (tm, tn) f32

    diag_rows = dcol_ref[...]       # (tm, 1): scores[r, r] for the rows of this tile
    diag_cols = drow_ref[...]       # (1, tn): scores[c, c] for the cols of this tile

    # cost_s[r, c]  = max(0, margin + scores[r, c] - scores[r, r])
    # cost_im[r, c] = max(0, margin + scores[r, c] - scores[c, c])
    cost_s = jnp.maximum(margin + scores - diag_rows, 0.0)
    cost_im = jnp.maximum(margin + scores - diag_cols, 0.0)

    # Zero the global diagonal (masked_fill_).  Off-diagonal tiles get an
    # all-false mask, so this is exact for every tile.
    rows = lax.broadcasted_iota(jnp.int32, (tm, tn), 0) + i * tm
    cols = lax.broadcasted_iota(jnp.int32, (tm, tn), 1) + j * tn
    off_diag = rows != cols
    cost_s = jnp.where(off_diag, cost_s, 0.0)
    cost_im = jnp.where(off_diag, cost_im, 0.0)

    first_step = jnp.logical_and(i == 0, j == 0)
    last_step = jnp.logical_and(i == num_i - 1, j == num_j - 1)

    @pl.when(first_step)
    def _():
        out_ref[...] = jnp.zeros_like(out_ref)

    if not max_violation:
        # Sum-of-hinges path: pure scalar accumulation, no extra scratch use.
        out_ref[...] = out_ref[...] + (jnp.sum(cost_s) + jnp.sum(cost_im))
    else:
        # Hardest-negative path: streaming row-max (over j, the inner grid
        # axis) and a persistent per-column running max (over i, the outer
        # grid axis).  All costs are >= 0, so zero-init is a valid identity.
        tile_row_max = jnp.max(cost_s, axis=1, keepdims=True)    # (tm, 1) lane reduce
        tile_col_max = jnp.max(cost_im, axis=0, keepdims=True)   # (1, tn)

        @pl.when(first_step)
        def _():
            col_max_ref[...] = jnp.zeros_like(col_max_ref)

        @pl.when(j == 0)
        def _():
            row_max_ref[...] = jnp.zeros_like(row_max_ref)

        row_max_ref[...] = jnp.maximum(row_max_ref[...], tile_row_max)
        col_max_ref[j] = jnp.maximum(col_max_ref[j], tile_col_max)

        @pl.when(j == num_j - 1)
        def _():
            out_ref[...] = out_ref[...] + jnp.sum(row_max_ref[...])

        @pl.when(last_step)
        def _():
            out_ref[...] = out_ref[...] + jnp.sum(col_max_ref[...])


def _pick_tile(b):
    """Largest MXU-friendly tile that divides the batch; fall back to full B."""
    for t in (512, 256, 128):
        if b % t == 0:
            return t
    return b  # small / awkward batch: single block along that axis


def contrastive_loss(im, s, margin=0.0, max_violation=False):
    """Pallas TPU implementation of ContrastiveLoss.forward (cosine_sim measure)."""
    # TODO(synk): measure='order' (order_sim) not implemented; cosine_sim path only.
    assert im.ndim == 2 and s.ndim == 2 and im.shape == s.shape
    B, D = im.shape

    tile = _pick_tile(B)
    tm = tn = tile
    num_i = B // tm
    num_j = B // tn

    # scores[k, k] = <im_k, s_k>: computed once as an O(B*D) row-wise dot
    # instead of extracting the diagonal from the full B x B score matrix.
    diag = jnp.sum(im.astype(jnp.float32) * s.astype(jnp.float32), axis=1)
    diag_col = diag.reshape(B, 1)   # broadcast down rows    (cost_s)
    diag_row = diag.reshape(1, B)   # broadcast across cols  (cost_im)

    kernel = functools.partial(
        _contrastive_loss_kernel,
        margin=float(margin), max_violation=bool(max_violation),
        tm=tm, tn=tn, num_i=num_i, num_j=num_j)

    out = pl.pallas_call(
        kernel,
        out_shape=jax.ShapeDtypeStruct((1, 1), jnp.float32),
        grid_spec=pltpu.PrefetchScalarGridSpec(
            num_scalar_prefetch=0,
            grid=(num_i, num_j),
            in_specs=[
                pl.BlockSpec((tm, D), lambda i, j: (i, 0)),   # im row tile
                pl.BlockSpec((tn, D), lambda i, j: (j, 0)),   # s row tile
                pl.BlockSpec((tm, 1), lambda i, j: (i, 0)),   # diag for this row tile
                pl.BlockSpec((1, tn), lambda i, j: (0, j)),   # diag for this col tile
            ],
            out_specs=pl.BlockSpec((1, 1), lambda i, j: (0, 0)),
            scratch_shapes=[
                pltpu.VMEM((tm, 1), jnp.float32),             # running row-max of cost_s
                pltpu.VMEM((num_j, 1, tn), jnp.float32),      # running col-max of cost_im
            ]),
        compiler_params=pltpu.CompilerParams(
            # Both grid axes feed the shared scalar accumulator / persistent
            # scratch, so neither can be megacore-parallel.
            dimension_semantics=("arbitrary", "arbitrary"),
            vmem_limit_bytes=48 * 1024 * 1024),
    )(im, s, diag_col, diag_row)
    return out[0, 0]


def _reference(im, s, margin=0.0, max_violation=False):
    scores = im @ s.T
    diag = jnp.diag(scores)[:, None]
    cost_s = jnp.maximum(margin + scores - diag, 0.0)
    cost_im = jnp.maximum(margin + scores - diag.T, 0.0)
    eye = jnp.eye(scores.shape[0], dtype=bool)
    cost_s = jnp.where(eye, 0.0, cost_s)
    cost_im = jnp.where(eye, 0.0, cost_im)
    if max_violation:
        return jnp.sum(jnp.max(cost_s, axis=1)) + jnp.sum(jnp.max(cost_im, axis=0))
    return jnp.sum(cost_s) + jnp.sum(cost_im)


if __name__ == "__main__":
    key = jax.random.PRNGKey(0)
    k_im, k_s = jax.random.split(key)
    B, D = 8, 32
    im = jax.random.normal(k_im, (B, D), dtype=jnp.float32)
    s = jax.random.normal(k_s, (B, D), dtype=jnp.float32)

    margin = 0.2
    for mv in (False, True):
        loss = jax.block_until_ready(
            contrastive_loss(im, s, margin=margin, max_violation=mv))
        ref = _reference(im, s, margin=margin, max_violation=mv)
        assert jnp.allclose(loss, ref, rtol=1e-5, atol=1e-5), (mv, loss, ref)
    print("KERNEL_OK")
</pallas_src>

<mosaic_0001>
module attributes {stable_mosaic.version = 11 : i64} {
  func.func @_contrastive_loss_kernel(%arg0: i32, %arg1: i32, %arg2: memref<8x32xf32, #tpu.memory_space<vmem>>, %arg3: memref<8x32xf32, #tpu.memory_space<vmem>>, %arg4: memref<8x1xf32, #tpu.memory_space<vmem>>, %arg5: memref<1x8xf32, #tpu.memory_space<vmem>>, %arg6: memref<1x1xf32, #tpu.memory_space<vmem>>, %arg7: memref<8x1xf32, #tpu.memory_space<vmem>>, %arg8: memref<1x1x8xf32, #tpu.memory_space<vmem>>) attributes {dimension_semantics = [#tpu.dimension_semantics<arbitrary>, #tpu.dimension_semantics<arbitrary>], iteration_bounds = array<i64: 1, 1>, scalar_prefetch = 0 : i64, scratch_operands = 2 : i64, tpu.core_type = #tpu.core_type<tc>, window_params = [{transform_indices = @transform_0, window_bounds = array<i64: 8, 32>}, {transform_indices = @transform_1, window_bounds = array<i64: 8, 32>}, {transform_indices = @transform_2, window_bounds = array<i64: 8, 1>}, {transform_indices = @transform_3, window_bounds = array<i64: 1, 8>}, {pipeline_mode = #tpu.pipeline_mode<synchronous>, transform_indices = @transform_4, window_bounds = array<i64: 1, 1>}]} {
    %c0 = arith.constant 0 : index
    %c0_0 = arith.constant 0 : index
    %0 = vector.load %arg2[%c0, %c0_0] : memref<8x32xf32, #tpu.memory_space<vmem>>, vector<8x32xf32>
    %c0_1 = arith.constant 0 : index
    %c0_2 = arith.constant 0 : index
    %1 = vector.load %arg3[%c0_1, %c0_2] : memref<8x32xf32, #tpu.memory_space<vmem>>, vector<8x32xf32>
    %cst = arith.constant dense<0.000000e+00> : vector<8x8xf32>
    %2 = tpu.matmul %0, %1, %cst {dimension_numbers = #tpu.dot_dimension_numbers<[1], [1], [0], [0], [0, 0, 1, 0], [], []>} : vector<8x32xf32>, vector<8x32xf32>, vector<8x8xf32> -> vector<8x8xf32>
    %c0_3 = arith.constant 0 : index
    %c0_4 = arith.constant 0 : index
    %3 = vector.load %arg4[%c0_3, %c0_4] : memref<8x1xf32, #tpu.memory_space<vmem>>, vector<8x1xf32>
    %c0_5 = arith.constant 0 : index
    %c0_6 = arith.constant 0 : index
    %4 = vector.load %arg5[%c0_5, %c0_6] : memref<1x8xf32, #tpu.memory_space<vmem>>, vector<1x8xf32>
    %cst_7 = arith.constant 2.000000e-01 : f32
    %5 = vector.broadcast %cst_7 : f32 to vector<8x8xf32>
    %6 = arith.addf %5, %2 : vector<8x8xf32>
    %7 = vector.broadcast %3 : vector<8x1xf32> to vector<8x8xf32>
    %8 = arith.subf %6, %7 : vector<8x8xf32>
    %cst_8 = arith.constant 0.000000e+00 : f32
    %9 = vector.broadcast %cst_8 : f32 to vector<8x8xf32>
    %10 = arith.maximumf %8, %9 : vector<8x8xf32>
    %cst_9 = arith.constant 2.000000e-01 : f32
    %11 = vector.broadcast %cst_9 : f32 to vector<8x8xf32>
    %12 = arith.addf %11, %2 : vector<8x8xf32>
    %13 = vector.broadcast %4 : vector<1x8xf32> to vector<8x8xf32>
    %14 = arith.subf %12, %13 : vector<8x8xf32>
    %cst_10 = arith.constant 0.000000e+00 : f32
    %15 = vector.broadcast %cst_10 : f32 to vector<8x8xf32>
    %16 = arith.maximumf %14, %15 : vector<8x8xf32>
    %17 = tpu.iota {dimensions = array<i32: 0>} : vector<8x8xi32>
    %c8_i32 = arith.constant 8 : i32
    %18 = arith.muli %arg0, %c8_i32 : i32
    %19 = vector.broadcast %18 : i32 to vector<8x8xi32>
    %20 = arith.addi %17, %19 : vector<8x8xi32>
    %21 = tpu.iota {dimensions = array<i32: 1>} : vector<8x8xi32>
    %c8_i32_11 = arith.constant 8 : i32
    %22 = arith.muli %arg1, %c8_i32_11 : i32
    %23 = vector.broadcast %22 : i32 to vector<8x8xi32>
    %24 = arith.addi %21, %23 : vector<8x8xi32>
    %25 = arith.cmpi ne, %20, %24 : vector<8x8xi32>
    %cst_12 = arith.constant 0.000000e+00 : f32
    %26 = vector.broadcast %cst_12 : f32 to vector<8x8xf32>
    %27 = arith.select %25, %10, %26 : vector<8x8xi1>, vector<8x8xf32>
    %cst_13 = arith.constant 0.000000e+00 : f32
    %28 = vector.broadcast %cst_13 : f32 to vector<8x8xf32>
    %29 = arith.select %25, %16, %28 : vector<8x8xi1>, vector<8x8xf32>
    %c0_i32 = arith.constant 0 : i32
    %30 = arith.cmpi eq, %arg0, %c0_i32 : i32
    %c0_i32_14 = arith.constant 0 : i32
    %31 = arith.cmpi eq, %arg1, %c0_i32_14 : i32
    %32 = arith.andi %30, %31 : i1
    %33 = arith.extui %32 : i1 to i32
    %c0_i32_15 = arith.constant 0 : i32
    %34 = arith.cmpi ne, %33, %c0_i32_15 : i32
    scf.if %34 {
      %cst_22 = arith.constant 0.000000e+00 : f32
      %48 = vector.broadcast %cst_22 : f32 to vector<1x1xf32>
      %c0_23 = arith.constant 0 : index
      %c0_24 = arith.constant 0 : index
      %49 = vector.load %arg6[%c0_23, %c0_24] : memref<1x1xf32, #tpu.memory_space<vmem>>, vector<1x1xf32>
      tpu.vector_store %arg6[%c0_23, %c0_24], %48 {strides = array<i32>} : memref<1x1xf32, #tpu.memory_space<vmem>>, vector<1x1xf32>,
    } else {
    }
    %c0_16 = arith.constant 0 : index
    %c0_17 = arith.constant 0 : index
    %35 = vector.load %arg6[%c0_16, %c0_17] : memref<1x1xf32, #tpu.memory_space<vmem>>, vector<1x1xf32>
    %36 = vector.shape_cast %27 : vector<8x8xf32> to vector<1x8x8xf32>
    %cst_18 = arith.constant dense<0.000000e+00> : vector<1xf32>
    %37 = vector.multi_reduction <add>, %36, %cst_18 [1, 2] : vector<1x8x8xf32> to vector<1xf32>
    %38 = vector.shape_cast %37 : vector<1xf32> to vector<1x1x1xf32>
    %39 = vector.extract %38[0, 0, 0] : f32 from vector<1x1x1xf32>
    %40 = vector.shape_cast %29 : vector<8x8xf32> to vector<1x8x8xf32>
    %cst_19 = arith.constant dense<0.000000e+00> : vector<1xf32>
    %41 = vector.multi_reduction <add>, %40, %cst_19 [1, 2] : vector<1x8x8xf32> to vector<1xf32>
    %42 = vector.shape_cast %41 : vector<1xf32> to vector<1x1x1xf32>
    %43 = vector.extract %42[0, 0, 0] : f32 from vector<1x1x1xf32>
    %44 = arith.addf %39, %43 : f32
    %45 = vector.broadcast %44 : f32 to vector<1x1xf32>
    %46 = arith.addf %35, %45 : vector<1x1xf32>
    %c0_20 = arith.constant 0 : index
    %c0_21 = arith.constant 0 : index
    %47 = vector.load %arg6[%c0_20, %c0_21] : memref<1x1xf32, #tpu.memory_space<vmem>>, vector<1x1xf32>
    tpu.vector_store %arg6[%c0_20, %c0_21], %46 {strides = array<i32>} : memref<1x1xf32, #tpu.memory_space<vmem>>, vector<1x1xf32>,
    return
  }
  func.func @transform_0(%arg0: i32, %arg1: i32) -> (i32, i32) {
    %c0_i32 = arith.constant 0 : i32
    %c0_i32_0 = arith.constant 0 : i32
    return %arg0, %c0_i32 : i32, i32
  }
  func.func @transform_1(%arg0: i32, %arg1: i32) -> (i32, i32) {
    %c0_i32 = arith.constant 0 : i32
    %c0_i32_0 = arith.constant 0 : i32
    return %arg1, %c0_i32 : i32, i32
  }
  func.func @transform_2(%arg0: i32, %arg1: i32) -> (i32, i32) {
    %c0_i32 = arith.constant 0 : i32
    %c0_i32_0 = arith.constant 0 : i32
    return %arg0, %c0_i32 : i32, i32
  }
  func.func @transform_3(%arg0: i32, %arg1: i32) -> (i32, i32) {
    %c0_i32 = arith.constant 0 : i32
    %c0_i32_0 = arith.constant 0 : i32
    return %c0_i32, %arg1 : i32, i32
  }
  func.func @transform_4(%arg0: i32, %arg1: i32) -> (i32, i32) {
    %c0_i32 = arith.constant 0 : i32
    %c0_i32_0 = arith.constant 0 : i32
    %c0_i32_1 = arith.constant 0 : i32
    return %c0_i32, %c0_i32_0 : i32, i32
  }
}

</mosaic_0001>

<bundles_post_ra>
// kernel: tpu_custom_call.1
= control target key start
LH: loop header
LB: loop body
LE: loop exit
PB: predicated region body
PF: predicated region fallthrough
CT: control target
= control target key end

     0   :  { %9 = vsyncpa [#allocation5], 0  ;;  %s322_s0 = inlined_call_operand.vmem [shape: f32[8,32], index: 0, kind: input, shape index: {}]   ;;  %s323_s1 = inlined_call_operand.hbm [shape: f32[8,32], index: 1, kind: input, shape index: {}]   ;;  %s324_s2 = inlined_call_operand.vmem [shape: f32[8,1], index: 2, kind: input, shape index: {}]   ;;  %s325_s3 = inlined_call_operand.vmem [shape: f32[1,8], index: 3, kind: input, shape index: {}]   ;;  %s326_s4 = inlined_call_operand.hbm [shape: f32[1,1], index: 4, kind: output, shape index: {}]  }
   0x1   :  { %10 = vsyncpa [#allocation6], 0  ;;  %s257_s15 = smov [#allocation4]   ;;  %s209_s19 = scalar_lea.hbm %s323_s1, 128 }
   0x2   :  { %s19_s16 = sshll.u32 %s257_s15, 4  ;;  %p210_p0 = scmp.ne.s32.totalorder %s323_s1, %s209_s19  ;;  %s20_s16 = int_to_ptr.vmem [resolvable:$true] %s19_s16 }
   0x3   :  { %p213_p1 = scmp.lt.u32.totalorder %s209_s19, %s323_s1 }
   0x5   :  { %p215_p2 = pnand %p213_p1, %p210_p0 }
   0x7   :  { %218 = shalt.err (!%p215_p2)
}
   0x8   :  { %s219_s24 = scalar_lea.vmem %s20_s16, 128  ;;  %p224_p4 = scmp.lt.s32.totalorder %s20_s16, %s20_s16 }
   0x9   :  { %p220_p3 = scmp.ne.s32.totalorder %s20_s16, %s219_s24  ;;  %p225_p5 = scmp.lt.s32.totalorder %s219_s24, %s219_s24 }
   0xb   :  { %p226_p6 = por %p225_p5, %p224_p4 }
   0xd   :  { %p227_p7 = pnand %p226_p6, %p220_p3 }
   0xf   :  { %230 = shalt.err (!%p227_p7)
}
  0x10   :  { %22 = dma.hbm_to_vmem [thread:$0]  %s323_s1, 128, %s20_s16, [#allocation5]  }
  0x11   :  { %253 = dma.done.wait [#allocation5], 128  }
  0x12   :  { %254 = vsyncadd [#allocation5], 4294967168  ;;  %vm145_vm0 = vcmask 0   ;;  %v258_v0 = vmov 0.0   ;;  %vm259_vm1 = vmmov 0   ;;  %v260_v1 = vmov 0  }
  0x13   :  { %194 = vmatprep.subr.mxu0 %v258_v0  ;;  %146 = vst.msk [vmem:[#allocation7] sm:$0x1] %vm145_vm0, %v258_v0  ;;  %196 = vmatprep.mubr.msk.f32.mxu0 %vm259_vm1, %v258_v0  ;;  %vm34_vm2 = vcmask 261120   ;;  %v31_v2 = vld [vmem:[#allocation4] sm:$0xff]  ;;  %v126_v5 = vlaneseq  ;;  %vm148_vm4 = vcmask 64512   ;;  %s261_s6 = smov [#allocation7]  }
  0x14   :  { %208 = vset.pattern.permute.xlu0 %v260_v1  ;;  %v32_v3 = vld [vmem:[%s324_s2] sm:$0xff]  ;;  %195 = vmatpush3.xpose.msk.msra.mxu0 %vm34_vm2, %v31_v2  ;;  %s180_s7 = sshll.u32 %s261_s6, 4  ;;  %s181_s7 = int_to_ptr.vmem [resolvable:$true] %s180_s7 }
  0x15   :  { %v30_v4 = vld [vmem:[%s322_s0] sm:$0xff]  ;;  %113 = vperm.xlu0 %208, %v32_v3   ;;  %v127_v9 = vshrl.u32 %v126_v5, 7  ;;  %v132_v10 = vand.u32 127, %v126_v5  ;;  %s231_s8 = scalar_lea.vmem %s181_s7, 16  ;;  %s235_s9 = scalar_lea.vmem %s181_s7, 32 }
  0x16   :  { %v191_v6 = vld [vmem:[%s325_s3] ss:$0 sm:$0xff]  ;;  %p232_p8 = scmp.ne.s32.totalorder %s181_s7, %s231_s8  ;;  %p236_p9 = scmp.lt.s32.totalorder %s181_s7, %s181_s7 }
  0x17   :  { %197 = vmatmul.mubr.msk.f32.vlgmr.msra.gmra.mrb[0].mxu0 %vm34_vm2, %v30_v4  ;;  %vm136_vm3 = vcmp.ne.s32.totalorder %v127_v9, %v132_v10  ;;  %p237_p10 = scmp.lt.s32.totalorder %s235_s9, %s231_s8 }
  0x19   :  { %p238_p11 = por %p237_p10, %p236_p9 }
  0x1a   :  { %v147_v35 = vld [vmem:[#allocation7] sm:$0x1] }
  0x1b   :  { %p239_p12 = pnand %p238_p11, %p232_p8 }
  0x94   :  { %v114_v8 = vpop.permute.xlu0 %113 }
  0xea   :  { %v107_v7 = vpop.f32.mrb[0].mxu0 }
  0xeb   :  { %v108_v11 = vadd.f32 0.2, %v107_v7  ;;  %v198_v12 = vpop.f32.mrb[1].mxu0 }
  0xed   :  { %v124_v13 = vsub.f32 %v108_v11, %v191_v6  ;;  %v116_v14 = vsub.f32 %v108_v11, %v114_v8 }
  0xef   :  { %v117_v15 = vmax.f32 %v116_v14, 0.0  ;;  %v125_v16 = vmax.f32 %v124_v13, 0.0 }
  0xf1   :  { %v138_v17 = vsel %vm136_vm3, %v125_v16, 0.0  ;;  %v137_v18 = vsel %vm136_vm3, %v117_v15, 0.0 }
  0xf2   :  { %v159_v19 = vsel %vm148_vm4, %v138_v17, 0.0  ;;  %v149_v20 = vsel %vm148_vm4, %v137_v18, 0.0 }
  0xf3   :  { %160 = vadd.xlane.f32.xlu1 %v159_v19  ;;  %150 = vadd.xlane.f32.xlu0 %v149_v20 }
 0x180   :  { %v161_v21 = vpop.xlane.xlu1 %160  ;;  %v151_v22 = vpop.xlane.xlu0 %150 }
 0x181   :  { %v162_v23 = vrot.slane %v161_v21, 4  ;;  %v152_v24 = vrot.slane %v151_v22, 4 }
 0x183   :  { %v163_v25 = vadd.f32 %v162_v23, %v161_v21  ;;  %v153_v26 = vadd.f32 %v152_v24, %v151_v22 }
 0x185   :  { %v164_v27 = vrot.slane %v163_v25, 2  ;;  %v154_v28 = vrot.slane %v153_v26, 2 }
 0x187   :  { %v165_v29 = vadd.f32 %v164_v27, %v163_v25  ;;  %v155_v30 = vadd.f32 %v154_v28, %v153_v26 }
 0x189   :  { %v156_v31 = vrot.slane %v155_v30, 1  ;;  %v166_v32 = vrot.slane %v165_v29, 1 }
 0x18b   :  { %v157_v33 = vadd.f32 %v156_v31, %v155_v30  ;;  %v167_v34 = vadd.f32 %v166_v32, %v165_v29 }
 0x18d   :  { %199 = vpush %v157_v33 }
 0x18e   :  { %201 = vpush %v167_v34 }
 0x1be   :  { %s200_s0 = spop %199 }
 0x1bf   :  { %s202_s2 = spop %201 }
 0x1c0   :  { %s169_s3 = sadd.f32 %s202_s2, %s200_s0 }
 0x1c2   :  { %v170_v36 = vstv %s169_s3 }
 0x1c3   :  { %v171_v37 = vadd.f32 %v170_v36, %v147_v35 }
 0x1c5   :  { %173 = vst.msk [vmem:[#allocation7] sm:$0x1] %vm145_vm0, %v171_v37 }
 0x1c6   :  { %242 = shalt.err (!%p239_p12)
}
 0x1c7   :  { %s243_s12 = scalar_lea.hbm %s326_s4, 16 }
 0x1c8   :  { %p244_p13 = scmp.ne.s32.totalorder %s326_s4, %s243_s12  ;;  %p247_p0 = scmp.lt.u32.totalorder %s243_s12, %s326_s4 }
 0x1ca   :  { %p249_p1 = pnand %p247_p0, %p244_p13 }
 0x1cc   :  { %252 = shalt.err (!%p249_p1)
}
 0x1cd   :  { %183 = dma.vmem_to_hbm [thread:$0]  %s181_s7, 16, %s326_s4, [#allocation6]  }
 0x1ce   :  { %255 = dma.done.wait [#allocation6], 16  }
 0x1cf   :  { %256 = vsyncadd [#allocation6], 4294967280 }
 0x1d0   :  { %187 = vsyncpa [#allocation5], 1 }
 0x1d1   :  { %188 = vsyncpa [#allocation6], 1 }

</bundles_post_ra>
